<compile_context>
chip_gen: v7x
topology: tpu7x:2x2x1
jax: 0.10.0
libtpu: 0.0.40
codegen_flags: <defaults>
</compile_context>

<pallas_src>
import functools
import math

import jax
import jax.numpy as jnp
from jax import lax
from jax.experimental import pallas as pl
from jax.experimental.pallas import tpu as pltpu


def _mlp_pool_kernel(x_ref, w1_ref, b1_ref, w2_ref, b2_ref, o_ref):
    # fc1 on the MXU, f32 accumulate
    h = jnp.dot(x_ref[...], w1_ref[...], preferred_element_type=jnp.float32)
    h = h + b1_ref[...]                       # b1 is (1, hidden), broadcasts over rows

    # exact GELU (torch.nn.functional.gelu default, erf-based)
    h = 0.5 * h * (1.0 + lax.erf(h * (1.0 / math.sqrt(2.0))))

    # fc2 with the avg_pool already folded into the weight (W2' computed once in prepare_params)
    out = jnp.dot(h, w2_ref[...], preferred_element_type=jnp.float32)
    o_ref[...] = out + b2_ref[...]            # output is already float32


def prepare_params(w1, b1, w2, b2, *, use_bf16_operands=False):
    """One-time weight preparation.  Call ONCE (e.g. at module init), not per forward.

    Folds avg_pool1d(k=3, stride=1, pad=1, count_include_pad=True) into fc2's weight:
      p = pool(h)  =>  p @ W2 == h @ W2'  with  W2'[i] = (W2[i-1] + W2[i] + W2[i+1]) / 3
    (out-of-range rows treated as zero).  Exact, no (hidden, hidden) temporary.
    Also zero-pads the output columns to a multiple of 128 lanes for an unmasked store.
    """
    hidden, out_size = w2.shape

    shift_up = jnp.pad(w2[1:, :], ((0, 1), (0, 0)))     # row i <- W2[i+1]
    shift_dn = jnp.pad(w2[:-1, :], ((1, 0), (0, 0)))    # row i <- W2[i-1]
    w2_eff = (w2 + shift_up + shift_dn) * (1.0 / 3.0)   # (hidden, out_size)

    out_pad = max(128, ((out_size + 127) // 128) * 128)
    w2_p = jnp.zeros((hidden, out_pad), jnp.float32).at[:, :out_size].set(w2_eff)
    b2_p = jnp.zeros((1, out_pad), jnp.float32).at[:, :out_size].set(b2)

    b1_p = jnp.asarray(b1, jnp.float32).reshape(1, -1)
    w1_p = jnp.asarray(w1, jnp.float32)

    if use_bf16_operands:
        # Optional v6e/v7x fast path: bf16 MXU operands, f32 accumulate (loosen tolerance).
        w1_p = w1_p.astype(jnp.bfloat16)
        w2_p = w2_p.astype(jnp.bfloat16)

    # Materialize now so the prep cost is paid exactly once, not lazily at first forward.
    w1_p, b1_p, w2_p, b2_p = jax.block_until_ready((w1_p, b1_p, w2_p, b2_p))
    return w1_p, b1_p, w2_p, b2_p, out_size


@functools.partial(jax.jit, static_argnames=("out_size",))
def my_module_forward(x, w1, b1, w2_p, b2_p, out_size):
    """Forward pass: GELU(x @ W1 + b1) @ W2' + b2, output float32."""
    B, in_size = x.shape
    hidden = w1.shape[1]
    out_pad = w2_p.shape[1]

    # Tile the batch only when it is large enough to matter (keeps weights resident via
    # constant index maps; "parallel" lets megacore / v7x's 2 TCs split the M axis).
    if B >= 256 and B % 128 == 0:
        tile_m = 128
    else:
        tile_m = B
    grid = (B // tile_m,)

    cost = pl.CostEstimate(
        flops=2 * B * (in_size * hidden + hidden * out_pad),
        transcendentals=B * hidden,
        bytes_accessed=(x.size * x.dtype.itemsize
                        + w1.size * w1.dtype.itemsize
                        + b1.size * b1.dtype.itemsize
                        + w2_p.size * w2_p.dtype.itemsize
                        + b2_p.size * b2_p.dtype.itemsize
                        + B * out_pad * 4),
    )

    out_padded = pl.pallas_call(
        _mlp_pool_kernel,
        out_shape=jax.ShapeDtypeStruct((B, out_pad), jnp.float32),
        grid=grid,
        in_specs=[
            pl.BlockSpec((tile_m, in_size), lambda i: (i, 0)),
            pl.BlockSpec(w1.shape, lambda i: (0, 0)),
            pl.BlockSpec(b1.shape, lambda i: (0, 0)),
            pl.BlockSpec(w2_p.shape, lambda i: (0, 0)),
            pl.BlockSpec(b2_p.shape, lambda i: (0, 0)),
        ],
        out_specs=pl.BlockSpec((tile_m, out_pad), lambda i: (i, 0)),
        compiler_params=pltpu.CompilerParams(dimension_semantics=("parallel",)),
        cost_estimate=cost,
    )(x, w1, b1, w2_p, b2_p)

    # Slice back to the true output width; fused inside this jit (no extra dispatch).
    return out_padded[:, :out_size]


if __name__ == "__main__":
    # Small shapes consistent with the module.
    batch, input_size, hidden_size, output_size = 8, 32, 128, 32

    key = jax.random.PRNGKey(0)
    kx, k1, kb1, k2, kb2 = jax.random.split(key, 5)

    x = jax.random.normal(kx, (batch, input_size), dtype=jnp.float32)

    # Deterministic parameter init (Linear-like uniform bounds).
    lim1 = 1.0 / math.sqrt(input_size)
    w1 = jax.random.uniform(k1, (input_size, hidden_size), jnp.float32, -lim1, lim1)
    b1 = jax.random.uniform(kb1, (1, hidden_size), jnp.float32, -lim1, lim1)
    lim2 = 1.0 / math.sqrt(hidden_size)
    w2 = jax.random.uniform(k2, (hidden_size, output_size), jnp.float32, -lim2, lim2)
    b2 = jax.random.uniform(kb2, (1, output_size), jnp.float32, -lim2, lim2)

    # One-time prep (amortized across all subsequent forwards).
    w1_p, b1_p, w2_p, b2_p, out_size = prepare_params(w1, b1, w2, b2)

    out = my_module_forward(x, w1_p, b1_p, w2_p, b2_p, out_size)
    out = jax.block_until_ready(out)

    # Pure-JAX reference (explicit pooling path, matches the PyTorch module).
    h_ref = x @ w1 + b1
    h_ref = 0.5 * h_ref * (1.0 + lax.erf(h_ref / math.sqrt(2.0)))
    hp = jnp.pad(h_ref, ((0, 0), (1, 1)))
    p_ref = (hp[:, :-2] + hp[:, 1:-1] + hp[:, 2:]) / 3.0
    ref = (p_ref @ w2 + b2).astype(jnp.float32)

    assert out.shape == ref.shape, "shape mismatch vs reference"
    assert jnp.allclose(out, ref, atol=1e-4, rtol=1e-5), "mismatch vs reference"

    print("KERNEL_OK")
</pallas_src>

<mosaic_0001>
module attributes {stable_mosaic.version = 11 : i64} {
  func.func @_mlp_pool_kernel(%arg0: i32, %arg1: memref<8x32xf32, #tpu.memory_space<vmem>>, %arg2: memref<32x128xf32, #tpu.memory_space<vmem>>, %arg3: memref<1x128xf32, #tpu.memory_space<vmem>>, %arg4: memref<128x128xf32, #tpu.memory_space<vmem>>, %arg5: memref<1x128xf32, #tpu.memory_space<vmem>>, %arg6: memref<8x128xf32, #tpu.memory_space<vmem>>) attributes {dimension_semantics = [#tpu.dimension_semantics<parallel>], iteration_bounds = array<i64: 1>, scalar_prefetch = 0 : i64, scratch_operands = 0 : i64, tpu.core_type = #tpu.core_type<tc>, window_params = [{transform_indices = @transform_0, window_bounds = array<i64: 8, 32>}, {pipeline_mode = #tpu.pipeline_mode<synchronous>, transform_indices = @transform_1, window_bounds = array<i64: 32, 128>}, {pipeline_mode = #tpu.pipeline_mode<synchronous>, transform_indices = @transform_2, window_bounds = array<i64: 1, 128>}, {pipeline_mode = #tpu.pipeline_mode<synchronous>, transform_indices = @transform_3, window_bounds = array<i64: 128, 128>}, {pipeline_mode = #tpu.pipeline_mode<synchronous>, transform_indices = @transform_4, window_bounds = array<i64: 1, 128>}, {transform_indices = @transform_5, window_bounds = array<i64: 8, 128>}]} {
    %c0 = arith.constant 0 : index
    %c0_0 = arith.constant 0 : index
    %0 = vector.load %arg1[%c0, %c0_0] : memref<8x32xf32, #tpu.memory_space<vmem>>, vector<8x32xf32>
    %c0_1 = arith.constant 0 : index
    %c0_2 = arith.constant 0 : index
    %1 = vector.load %arg2[%c0_1, %c0_2] : memref<32x128xf32, #tpu.memory_space<vmem>>, vector<32x128xf32>
    %cst = arith.constant dense<0.000000e+00> : vector<8x128xf32>
    %2 = tpu.matmul %0, %1, %cst {dimension_numbers = #tpu.dot_dimension_numbers<[1], [0], [0], [1], [0, 0, 1, 1], [], []>} : vector<8x32xf32>, vector<32x128xf32>, vector<8x128xf32> -> vector<8x128xf32>
    %c0_3 = arith.constant 0 : index
    %c0_4 = arith.constant 0 : index
    %3 = vector.load %arg3[%c0_3, %c0_4] : memref<1x128xf32, #tpu.memory_space<vmem>>, vector<1x128xf32>
    %4 = vector.broadcast %3 : vector<1x128xf32> to vector<8x128xf32>
    %5 = arith.addf %2, %4 : vector<8x128xf32>
    %cst_5 = arith.constant 5.000000e-01 : f32
    %6 = vector.broadcast %cst_5 : f32 to vector<8x128xf32>
    %7 = arith.mulf %6, %5 : vector<8x128xf32>
    %cst_6 = arith.constant 0.707106769 : f32
    %8 = vector.broadcast %cst_6 : f32 to vector<8x128xf32>
    %9 = arith.mulf %5, %8 : vector<8x128xf32>
    %10 = math.erf %9 : vector<8x128xf32>
    %cst_7 = arith.constant 1.000000e+00 : f32
    %11 = vector.broadcast %cst_7 : f32 to vector<8x128xf32>
    %12 = arith.addf %11, %10 : vector<8x128xf32>
    %13 = arith.mulf %7, %12 : vector<8x128xf32>
    %c0_8 = arith.constant 0 : index
    %c0_9 = arith.constant 0 : index
    %14 = vector.load %arg4[%c0_8, %c0_9] : memref<128x128xf32, #tpu.memory_space<vmem>>, vector<128x128xf32>
    %cst_10 = arith.constant dense<0.000000e+00> : vector<8x128xf32>
    %15 = tpu.matmul %13, %14, %cst_10 {dimension_numbers = #tpu.dot_dimension_numbers<[1], [0], [0], [1], [0, 0, 1, 1], [], []>} : vector<8x128xf32>, vector<128x128xf32>, vector<8x128xf32> -> vector<8x128xf32>
    %c0_11 = arith.constant 0 : index
    %c0_12 = arith.constant 0 : index
    %16 = vector.load %arg5[%c0_11, %c0_12] : memref<1x128xf32, #tpu.memory_space<vmem>>, vector<1x128xf32>
    %17 = vector.broadcast %16 : vector<1x128xf32> to vector<8x128xf32>
    %18 = arith.addf %15, %17 : vector<8x128xf32>
    %c0_13 = arith.constant 0 : index
    %c0_14 = arith.constant 0 : index
    %19 = vector.load %arg6[%c0_13, %c0_14] : memref<8x128xf32, #tpu.memory_space<vmem>>, vector<8x128xf32>
    tpu.vector_store %arg6[%c0_13, %c0_14], %18 {strides = array<i32>} : memref<8x128xf32, #tpu.memory_space<vmem>>, vector<8x128xf32>,
    return
  }
  func.func @transform_0(%arg0: i32) -> (i32, i32) {
    %c0_i32 = arith.constant 0 : i32
    %c0_i32_0 = arith.constant 0 : i32
    return %arg0, %c0_i32 : i32, i32
  }
  func.func @transform_1(%arg0: i32) -> (i32, i32) {
    %c0_i32 = arith.constant 0 : i32
    %c0_i32_0 = arith.constant 0 : i32
    %c0_i32_1 = arith.constant 0 : i32
    return %c0_i32, %c0_i32_0 : i32, i32
  }
  func.func @transform_2(%arg0: i32) -> (i32, i32) {
    %c0_i32 = arith.constant 0 : i32
    %c0_i32_0 = arith.constant 0 : i32
    %c0_i32_1 = arith.constant 0 : i32
    return %c0_i32, %c0_i32_0 : i32, i32
  }
  func.func @transform_3(%arg0: i32) -> (i32, i32) {
    %c0_i32 = arith.constant 0 : i32
    %c0_i32_0 = arith.constant 0 : i32
    %c0_i32_1 = arith.constant 0 : i32
    return %c0_i32, %c0_i32_0 : i32, i32
  }
  func.func @transform_4(%arg0: i32) -> (i32, i32) {
    %c0_i32 = arith.constant 0 : i32
    %c0_i32_0 = arith.constant 0 : i32
    %c0_i32_1 = arith.constant 0 : i32
    return %c0_i32, %c0_i32_0 : i32, i32
  }
  func.func @transform_5(%arg0: i32) -> (i32, i32) {
    %c0_i32 = arith.constant 0 : i32
    %c0_i32_0 = arith.constant 0 : i32
    return %arg0, %c0_i32 : i32, i32
  }
}

</mosaic_0001>

<bundles_post_ra>
// kernel: my_module_forward.1
= control target key start
LH: loop header
LB: loop body
LE: loop exit
PB: predicated region body
PF: predicated region fallthrough
CT: control target
= control target key end

     0   :  { %10 = vsyncpa [#allocation3], 0  ;;  %s566_s0 = inlined_call_operand.hbm [shape: f32[8,32], index: 0, kind: input, shape index: {}]   ;;  %s567_s1 = inlined_call_operand.hbm [shape: f32[32,128], index: 1, kind: input, shape index: {}]   ;;  %s568_s2 = inlined_call_operand.vmem [shape: f32[1,128], index: 2, kind: input, shape index: {}]   ;;  %s569_s3 = inlined_call_operand.hbm [shape: f32[128,128], index: 3, kind: input, shape index: {}]   ;;  %s570_s4 = inlined_call_operand.vmem [shape: f32[1,128], index: 4, kind: input, shape index: {}]   ;;  %s571_s5 = inlined_call_operand.hbm [shape: f32[8,128], index: 5, kind: output, shape index: {}]  }
   0x1   :  { %11 = vsyncpa [#allocation6], 0 }
   0x2   :  { %12 = vsyncpa [#allocation4], 0  ;;  %s467_s18 = smov [#allocation5]   ;;  %s373_s22 = scalar_lea.hbm %s567_s1, 512 }
   0x3   :  { %s28_s19 = sshll.u32 %s467_s18, 4  ;;  %p374_p0 = scmp.ne.s32.totalorder %s567_s1, %s373_s22  ;;  %s29_s19 = int_to_ptr.vmem [resolvable:$true] %s28_s19 }
   0x4   :  { %p377_p1 = scmp.lt.u32.totalorder %s373_s22, %s567_s1 }
   0x6   :  { %p379_p2 = pnand %p377_p1, %p374_p0 }
   0x8   :  { %382 = shalt.err (!%p379_p2)
}
   0x9   :  { %s383_s27 = scalar_lea.vmem %s29_s19, 512  ;;  %p388_p4 = scmp.lt.s32.totalorder %s29_s19, %s29_s19 }
   0xa   :  { %p384_p3 = scmp.ne.s32.totalorder %s29_s19, %s383_s27  ;;  %p389_p5 = scmp.lt.s32.totalorder %s383_s27, %s383_s27 }
   0xc   :  { %p390_p6 = por %p389_p5, %p388_p4 }
   0xe   :  { %p391_p7 = pnand %p390_p6, %p384_p3 }
  0x10   :  { %394 = shalt.err (!%p391_p7)
}
  0x11   :  { %s468_s28 = smov 128   ;;  %s469_s29 = smov 8  }
  0x12   :  { %34 = dma.hbm_to_vmem [thread:$0]  %s567_s1, 512, %s29_s19, [#allocation6], %s468_s28, %s468_s28, %s469_s29  }
  0x13   :  { %s470_s7 = smov [#allocation2]   ;;  %s471_s9 = smov [#allocation7]  }
  0x14   :  { %s19_s8 = sshll.u32 %s470_s7, 4  ;;  %s42_s10 = sshll.u32 %s471_s9, 4  ;;  %s20_s8 = int_to_ptr.vmem [resolvable:$true] %s19_s8  ;;  %s43_s10 = int_to_ptr.vmem [resolvable:$true] %s42_s10 }
  0x15   :  { %s395_s13 = scalar_lea.hbm %s566_s0, 128 }
  0x16   :  { %p396_p8 = scmp.ne.s32.totalorder %s566_s0, %s395_s13  ;;  %p399_p9 = scmp.lt.u32.totalorder %s395_s13, %s566_s0 }
  0x18   :  { %p401_p10 = pnand %p399_p9, %p396_p8 }
  0x1a   :  { %404 = shalt.err (!%p401_p10)
}
  0x1b   :  { %s405_s1 = scalar_lea.vmem %s20_s8, 128  ;;  %p410_p12 = scmp.lt.s32.totalorder %s20_s8, %s20_s8 }
  0x1c   :  { %p406_p11 = scmp.ne.s32.totalorder %s20_s8, %s405_s1  ;;  %p411_p13 = scmp.lt.s32.totalorder %s405_s1, %s405_s1 }
  0x1e   :  { %p412_p0 = por %p411_p13, %p410_p12 }
  0x20   :  { %p413_p1 = pnand %p412_p0, %p406_p11 }
  0x22   :  { %416 = shalt.err (!%p413_p1)
}
  0x23   :  { %22 = dma.hbm_to_vmem [thread:$0]  %s566_s0, 128, %s20_s8, [#allocation3]  }
  0x24   :  { %s417_s22 = scalar_lea.hbm %s569_s3, 2048 }
  0x25   :  { %p418_p2 = scmp.ne.s32.totalorder %s569_s3, %s417_s22  ;;  %p421_p3 = scmp.lt.u32.totalorder %s417_s22, %s569_s3 }
  0x27   :  { %p423_p4 = pnand %p421_p3, %p418_p2 }
  0x29   :  { %426 = shalt.err (!%p423_p4)
}
  0x2a   :  { %s427_s27 = scalar_lea.vmem %s43_s10, 2048  ;;  %p432_p6 = scmp.lt.s32.totalorder %s43_s10, %s43_s10 }
  0x2b   :  { %p428_p5 = scmp.ne.s32.totalorder %s43_s10, %s427_s27  ;;  %p433_p7 = scmp.lt.s32.totalorder %s427_s27, %s427_s27 }
  0x2d   :  { %p434_p8 = por %p433_p7, %p432_p6 }
  0x2f   :  { %p435_p9 = pnand %p434_p8, %p428_p5 }
  0x31   :  { %438 = shalt.err (!%p435_p9)
}
  0x32   :  { %48 = dma.hbm_to_vmem [thread:$0]  %s569_s3, 2048, %s43_s10, [#allocation6], %s468_s28, %s468_s28, %s469_s29  }
  0x33   :  { %461 = dma.done.wait [#allocation3], 128  }
  0x34   :  { %462 = vsyncadd [#allocation3], 4294967168 }
  0x35   :  { %463 = dma.done.wait [#allocation6], 2560  }
  0x36   :  { %464 = vsyncadd [#allocation6], 4294964736  ;;  %v472_v0 = vmov 0.0|0.0   ;;  %vm473_vm0 = vmmov 0   ;;  %v474_v1 = vmov 0.0   ;;  %v61_v2 = vld [vmem:[#allocation5] sm:$0xff] }
  0x37   :  { %332 = vmatprep.subr.bf16.mxu0 %v472_v0  ;;  %294 = vmatprep.mubr.msk.f32.mxu0 %vm473_vm0, %v474_v1  ;;  %v62_v3 = vld [vmem:[#allocation5 + $0x8] sm:$0xff]  ;;  %v63_v4 = vld [vmem:[#allocation5 + $0x10] sm:$0xff]  ;;  %v64_v6 = vld [vmem:[#allocation5 + $0x18] sm:$0xff]  ;;  %vm72_vm1 = vcmask 261120   ;;  %s475_s7 = smov [#allocation8]  }
  0x38   :  { %338 = vmatprep.subr.bf16.mxu1 %v472_v0  ;;  %329 = vmatprep.mubr.msk.f32.mxu1 %vm473_vm0, %v474_v1  ;;  %v333_v5 = vpack.c.bf16 %v62_v3, %v61_v2  ;;  %v151_v7 = vld [vmem:[#allocation7] sm:$0xff]  ;;  %v152_v8 = vld [vmem:[#allocation7 + $0x8] sm:$0xff]  ;;  %v153_v9 = vld [vmem:[#allocation7 + $0x10] sm:$0xff]  ;;  %v336_v11 = vpack.c.bf16 %v64_v6, %v63_v4  ;;  %s251_s8 = sshll.u32 %s475_s7, 4  ;;  %s252_s8 = int_to_ptr.vmem [resolvable:$true] %s251_s8 }
  0x39   :  { %v154_v10 = vld [vmem:[#allocation7 + $0x18] sm:$0xff]  ;;  %v339_v12 = vpack.c.bf16 %v152_v8, %v151_v7  ;;  %v155_v14 = vld [vmem:[#allocation7 + $0x20] sm:$0xff]  ;;  %v156_v15 = vld [vmem:[#allocation7 + $0x28] sm:$0xff]  ;;  %p444_p11 = scmp.lt.s32.totalorder %s252_s8, %s252_s8 }
  0x3a   :  { %334 = vmatpush3.bf16.msra.mxu0 %v333_v5  ;;  %v342_v13 = vpack.c.bf16 %v154_v10, %v153_v9  ;;  %v60_v16 = vld [vmem:[#allocation2] sm:$0xff]  ;;  %v345_v17 = vpack.c.bf16 %v156_v15, %v155_v14  ;;  %v157_v18 = vld [vmem:[#allocation7 + $0x30] sm:$0xff]  ;;  %v159_v21 = vld [vmem:[#allocation7 + $0x40] sm:$0xff] }
  0x3b   :  { %335 = vmatprep.subr.bf16.mxu0 %v472_v0  ;;  %340 = vmatpush3.bf16.msra.mxu1 %v339_v12  ;;  %v158_v19 = vld [vmem:[#allocation7 + $0x38] sm:$0xff]  ;;  %v160_v22 = vld [vmem:[#allocation7 + $0x48] sm:$0xff]  ;;  %v161_v24 = vld [vmem:[#allocation7 + $0x50] sm:$0xff] }
  0x3c   :  { %341 = vmatprep.subr.bf16.mxu1 %v472_v0  ;;  %v348_v20 = vpack.c.bf16 %v158_v19, %v157_v18  ;;  %v351_v23 = vpack.c.bf16 %v160_v22, %v159_v21  ;;  %v162_v25 = vld [vmem:[#allocation7 + $0x58] sm:$0xff]  ;;  %v163_v27 = vld [vmem:[#allocation7 + $0x60] sm:$0xff]  ;;  %v164_v28 = vld [vmem:[#allocation7 + $0x68] sm:$0xff] }
  0x3d   :  { %v354_v26 = vpack.c.bf16 %v162_v25, %v161_v24  ;;  %v357_v29 = vpack.c.bf16 %v164_v28, %v163_v27  ;;  %v165_v30 = vld [vmem:[#allocation7 + $0x70] sm:$0xff]  ;;  %v166_v31 = vld [vmem:[#allocation7 + $0x78] sm:$0xff] }
  0x3e   :  { %337 = vmatpush3.bf16.msra.mxu0 %v336_v11  ;;  %v360_v32 = vpack.c.bf16 %v166_v31, %v165_v30  ;;  %v261_v33 = vld [vmem:[%s568_s2] ss:$0 sm:$0xff]  ;;  %s439_s2 = scalar_lea.vmem %s252_s8, 128 }
  0x3f   :  { %343 = vmatpush3.bf16.msra.mxu1 %v342_v13  ;;  %v263_v42 = vld [vmem:[%s570_s4] ss:$0 sm:$0xff]  ;;  %p440_p10 = scmp.ne.s32.totalorder %s252_s8, %s439_s2  ;;  %p445_p12 = scmp.lt.s32.totalorder %s439_s2, %s439_s2 }
  0x40   :  { %344 = vmatprep.subr.bf16.mxu1 %v472_v0 }
  0x41   :  { %295 = vmatmul.mubr.msk.f32.vlgmr.msra.gmra.mrb[0].mxu0 %vm72_vm1, %v60_v16  ;;  %p446_p13 = por %p445_p12, %p444_p11 }
  0x43   :  { %346 = vmatpush3.bf16.msra.mxu1 %v345_v17  ;;  %p447_p0 = pnand %p446_p13, %p440_p10 }
  0x44   :  { %347 = vmatprep.subr.bf16.mxu1 %v472_v0 }
  0x47   :  { %349 = vmatpush3.bf16.msra.mxu1 %v348_v20 }
  0x48   :  { %350 = vmatprep.subr.bf16.mxu1 %v472_v0 }
  0x4b   :  { %352 = vmatpush3.bf16.msra.mxu1 %v351_v23 }
  0x4c   :  { %353 = vmatprep.subr.bf16.mxu1 %v472_v0 }
  0x4f   :  { %355 = vmatpush3.bf16.msra.mxu1 %v354_v26 }
  0x50   :  { %356 = vmatprep.subr.bf16.mxu1 %v472_v0 }
  0x53   :  { %358 = vmatpush3.bf16.msra.mxu1 %v357_v29 }
  0x54   :  { %359 = vmatprep.subr.bf16.mxu1 %v472_v0 }
  0x57   :  { %361 = vmatpush3.bf16.msra.mxu1 %v360_v32 }
 0x114   :  { %v142_v34 = vpop.f32.mrb[0].mxu0 }
 0x115   :  { %v143_v35 = vadd.f32 %v261_v33, %v142_v34  ;;  %v296_v36 = vpop.f32.mrb[1].mxu0 }
 0x117   :  { %v147_v37 = vmul.f32 0.70710677, %v143_v35  ;;  %v146_v39 = vmul.f32 0.5, %v143_v35 }
 0x119   :  { %371 = verf.f32 %v147_v37 }
 0x123   :  { %v372_v38 = vpop.eup %371 }
 0x124   :  { %v149_v40 = vadd.f32 1.0, %v372_v38 }
 0x126   :  { %v150_v41 = vmul.f32 %v149_v40, %v146_v39 }
 0x128   :  { %330 = vmatmul.mubr.f32.vlgmr.msra.gmra.mrb[0].mxu1 %v150_v41 }
 0x1fb   :  { %v240_v43 = vpop.f32.mrb[0].mxu1 }
 0x1fc   :  { %v241_v44 = vadd.f32 %v263_v42, %v240_v43  ;;  %v331_v45 = vpop.f32.mrb[1].mxu1 }
 0x1fe   :  { %244 = vst [vmem:[#allocation8] sm:$0xff] %v241_v44 }
 0x1ff   :  { %450 = shalt.err (!%p447_p0)
}
 0x200   :  { %s451_s11 = scalar_lea.hbm %s571_s5, 128 }
 0x201   :  { %p452_p1 = scmp.ne.s32.totalorder %s571_s5, %s451_s11  ;;  %p455_p2 = scmp.lt.u32.totalorder %s451_s11, %s571_s5 }
 0x203   :  { %p457_p3 = pnand %p455_p2, %p452_p1 }
 0x205   :  { %460 = shalt.err (!%p457_p3)
}
 0x206   :  { %254 = dma.vmem_to_hbm [thread:$0]  %s252_s8, 128, %s571_s5, [#allocation4]  }
 0x207   :  { %465 = dma.done.wait [#allocation4], 128  }
 0x208   :  { %466 = vsyncadd [#allocation4], 4294967168 }
 0x209   :  { %258 = vsyncpa [#allocation3], 1 }
 0x20a   :  { %259 = vsyncpa [#allocation6], 1 }
 0x20b   :  { %260 = vsyncpa [#allocation4], 1 }

</bundles_post_ra>
